<compile_context>
chip_gen: v7x
topology: tpu7x:2x2x1
jax: 0.10.0
libtpu: 0.0.40
codegen_flags: <defaults>
</compile_context>

<pallas_src>
import functools

import jax
import jax.numpy as jnp
from jax.experimental import pallas as pl
from jax.experimental.pallas import tpu as pltpu


# ----------------------------- Pallas kernels ------------------------------

def _stem_pool_kernel(xce_ref, xco_ref, w_ref, s_ref, sh_ref, o_ref, shift_scr):
    # Fused stem Conv1d(k=7, s=2, p=3, no bias) + BN + ReLU + MaxPool1d(k=3, s=2, p=1).
    # xce/xco: (1, L2, K*Cin) tap columns for the even / odd stem output rows,
    # w: (K*Cin, F0) (single matmul instead of K small ones), out: (1, L2, F0).
    w = w_ref[...]
    he = jnp.maximum(jnp.dot(xce_ref[0], w, preferred_element_type=jnp.float32)
                     * s_ref[...] + sh_ref[...], 0.0)
    ho = jnp.maximum(jnp.dot(xco_ref[0], w, preferred_element_type=jnp.float32)
                     * s_ref[...] + sh_ref[...], 0.0)
    # maxpool(3, s=2, p=1): out[l] = max(h[2l-1], h[2l], h[2l+1])
    #                              = max(ho[l-1], he[l], ho[l]).
    # ReLU output >= 0, so a 0 fill at l == 0 is equivalent to the -inf pad.
    shift_scr[...] = jnp.zeros(shift_scr.shape, jnp.float32)
    shift_scr[1:, :] = ho[:-1, :]
    o_ref[0] = jnp.maximum(jnp.maximum(he, ho), shift_scr[...])


def _block_kernel(xp_ref, *refs, K, d1, d2, pad1, pad2, L, has_se, has_res):
    # One fused XceptionBlock:
    #   sepconv1 -> BN -> ReLU -> (dropout = id) -> sepconv2 -> BN -> (SE)
    #   -> + residual -> ReLU, entirely in VMEM.
    # xp_ref: (1, L + 2*pad1, Cin) block input (already stride-subsampled by
    # the wrapper for stride-2 blocks), zero-padded for the first depthwise.
    it = iter(refs)
    dw1w_ref = next(it); dw1b_ref = next(it)
    pw1w_ref = next(it); pw1b_ref = next(it)
    bn1s_ref = next(it); bn1sh_ref = next(it)
    dw2w_ref = next(it); dw2b_ref = next(it)
    pw2w_ref = next(it); pw2b_ref = next(it)
    bn2s_ref = next(it); bn2sh_ref = next(it)
    if has_se:
        sew1_ref = next(it); sew2_ref = next(it)
    if has_res:
        resw_ref = next(it); resb_ref = next(it)
        resbs_ref = next(it); resbsh_ref = next(it)
    o_ref = next(it)
    pad2_scr = next(it)

    xp = xp_ref[0]                                   # (L + 2*pad1, Cin)
    x = xp[pad1:pad1 + L, :]                         # un-padded block input

    # residual path: 1x1 conv + folded BN, or identity
    if has_res:
        res = (jnp.dot(x, resw_ref[...], preferred_element_type=jnp.float32)
               + resb_ref[...]) * resbs_ref[...] + resbsh_ref[...]
    else:
        res = x

    # --- sepconv1: depthwise (K taps, dilation d1) + pointwise + BN + ReLU ---
    dw1w = dw1w_ref[...]                             # (K, Cin)
    acc = xp[0:L, :] * dw1w[0:1, :]
    for k in range(1, K):
        acc = acc + xp[k * d1:k * d1 + L, :] * dw1w[k:k + 1, :]
    h = acc + dw1b_ref[...]
    h = jnp.dot(h, pw1w_ref[...], preferred_element_type=jnp.float32) + pw1b_ref[...]
    h = jnp.maximum(h * bn1s_ref[...] + bn1sh_ref[...], 0.0)
    # dropout: identity (eval-mode semantics)

    # --- sepconv2: depthwise (K taps, dilation d2, stride 1) + pointwise + BN ---
    pad2_scr[...] = jnp.zeros(pad2_scr.shape, jnp.float32)
    pad2_scr[pad2:pad2 + L, :] = h
    dw2w = dw2w_ref[...]                             # (K, Cout)
    acc2 = pad2_scr[0:L, :] * dw2w[0:1, :]
    for k in range(1, K):
        acc2 = acc2 + pad2_scr[k * d2:k * d2 + L, :] * dw2w[k:k + 1, :]
    h2 = acc2 + dw2b_ref[...]
    h2 = jnp.dot(h2, pw2w_ref[...], preferred_element_type=jnp.float32) + pw2b_ref[...]
    h2 = h2 * bn2s_ref[...] + bn2sh_ref[...]

    # --- squeeze-and-excitation (fused epilogue) ---
    if has_se:
        avg = jnp.mean(h2, axis=0, keepdims=True)    # (1, Cout)
        z = jnp.maximum(jnp.dot(avg, sew1_ref[...],
                                preferred_element_type=jnp.float32), 0.0)
        attn = jax.nn.sigmoid(jnp.dot(z, sew2_ref[...],
                                      preferred_element_type=jnp.float32))
        h2 = h2 * attn

    # --- residual add + ReLU (fused epilogue) ---
    o_ref[0] = jnp.maximum(h2 + res, 0.0)


def _gca_head_kernel(x_ref, wsq_ref, sqs_ref, sqh_ref, w1_ref, b1_ref,
                     w2_ref, b2_ref, hw_ref, hb_ref, o_ref):
    # Fused GlobalContextAttention + global average pool + final Linear.
    x = x_ref[0]                                                  # (L, C)
    s = jnp.sum(x * wsq_ref[...], axis=1, keepdims=True)          # conv_squeeze (L, 1)
    s = jax.nn.sigmoid(s * sqs_ref[...] + sqh_ref[...])           # folded BN(1) + sigmoid
    xs = x * s                                                    # spatial attention
    avg = jnp.mean(xs, axis=0, keepdims=True)                     # (1, C)
    h = jnp.maximum(jnp.dot(avg, w1_ref[...],
                            preferred_element_type=jnp.float32) + b1_ref[...], 0.0)
    ch = jax.nn.sigmoid(jnp.dot(h, w2_ref[...],
                                preferred_element_type=jnp.float32) + b2_ref[...])
    out = x * ch                                                  # NOTE: x, not xs (matches PyTorch)
    pooled = jnp.mean(out, axis=0, keepdims=True)                 # global avg pool (1, C)
    # dropout: identity; final Linear
    o_ref[...] = jnp.dot(pooled, hw_ref[...],
                         preferred_element_type=jnp.float32) + hb_ref[...]


# --------------------------- pallas_call helper ------------------------------

def _pcall(kernel, batched, shared, out_shape, scratch=()):
    """Grid over the batch dim (marked "parallel" for v7x's 2 TensorCores);
    `batched` args get (1, ...) blocks, `shared` args are passed whole."""
    B = out_shape.shape[0]
    in_specs = []
    for a in batched:
        nd = a.ndim
        in_specs.append(pl.BlockSpec((1,) + a.shape[1:],
                                     lambda b, nd=nd: (b,) + (0,) * (nd - 1)))
    for a in shared:
        nd = a.ndim
        in_specs.append(pl.BlockSpec(a.shape, lambda b, nd=nd: (0,) * nd))
    nd_out = len(out_shape.shape)
    out_spec = pl.BlockSpec((1,) + out_shape.shape[1:],
                            lambda b, nd=nd_out: (b,) + (0,) * (nd - 1))
    return pl.pallas_call(
        kernel,
        grid=(B,),
        in_specs=in_specs,
        out_specs=out_spec,
        out_shape=out_shape,
        scratch_shapes=list(scratch),
        compiler_params=pltpu.CompilerParams(dimension_semantics=("parallel",)),
    )(*batched, *shared)


# ------------------------------- block wrapper --------------------------------

def xception_block(x, bp, K):
    B, L, Cin = x.shape
    s, d = bp['stride'], bp['dilation']
    if s == 2:
        # Strided depthwise (even dilation, even padding) and the strided 1x1
        # residual only touch even positions: subsample once, run stride-1
        # inside the kernel with half the dilation.
        assert d % 2 == 0 and L % 2 == 0
        x = x[:, ::2, :]
        d1 = d // 2
    else:
        d1 = d
    Lout = x.shape[1]
    pad1 = (K - 1) // 2 * d1
    pad2 = (K - 1) // 2 * d
    Cout = bp['pw1_w'].shape[1]
    xp = jnp.pad(x, ((0, 0), (pad1, pad1), (0, 0)))   # tiny, plain-JAX glue

    has_se = bp['se'] is not None
    has_res = bp['res'] is not None
    shared = [bp['dw1_w'], bp['dw1_b'], bp['pw1_w'], bp['pw1_b'],
              bp['bn1_s'], bp['bn1_sh'],
              bp['dw2_w'], bp['dw2_b'], bp['pw2_w'], bp['pw2_b'],
              bp['bn2_s'], bp['bn2_sh']]
    if has_se:
        shared += [bp['se']['w1'], bp['se']['w2']]
    if has_res:
        shared += [bp['res']['w'], bp['res']['b'],
                   bp['res']['bn_s'], bp['res']['bn_sh']]

    kern = functools.partial(_block_kernel, K=K, d1=d1, d2=d, pad1=pad1,
                             pad2=pad2, L=Lout, has_se=has_se, has_res=has_res)
    return _pcall(kern, [xp], shared,
                  jax.ShapeDtypeStruct((B, Lout, Cout), jnp.float32),
                  scratch=[pltpu.VMEM((Lout + 2 * pad2, Cout), jnp.float32)])


# ------------------------------ parameter init ------------------------------

def init_params(key, cfg):
    keys = iter(jax.random.split(key, 1024))

    def rnd(shape, scale=0.1):
        return scale * jax.random.normal(next(keys), shape, jnp.float32)

    def bn(c):
        gamma = 1.0 + rnd((c,))
        beta = rnd((c,))
        rm = rnd((c,))
        rv = 1.0 + 0.5 * jax.random.uniform(next(keys), (c,), jnp.float32)
        scale = gamma / jnp.sqrt(rv + 1e-5)
        shift = beta - rm * scale
        return scale.reshape(1, c), shift.reshape(1, c)

    K = cfg['kernel_size']
    F0 = cfg['initial_filters']
    Cin = cfg['input_channels']
    p = {'kernel_size': K}
    p['stem_w'] = rnd((7 * Cin, F0))             # Conv1d(Cin,F0,7,s=2,p=3,no bias), taps flattened
    p['bn1_s'], p['bn1_sh'] = bn(F0)

    blocks = []
    filters = F0
    for i in range(cfg['depth']):
        if i % 2 == 0 and i > 0:
            stride = 2
            filters *= 2
        else:
            stride = 1
        dilation = 2 ** (i % 3)
        in_ch = filters // 2 if (i > 0 and stride == 2) else (F0 if i == 0 else filters)
        out_ch = filters
        use_se = (i % 2 == 0)

        bp = {'stride': stride, 'dilation': dilation}
        bp['dw1_w'] = rnd((K, in_ch));      bp['dw1_b'] = rnd((1, in_ch))
        bp['pw1_w'] = rnd((in_ch, out_ch)); bp['pw1_b'] = rnd((1, out_ch))
        bp['bn1_s'], bp['bn1_sh'] = bn(out_ch)
        bp['dw2_w'] = rnd((K, out_ch));     bp['dw2_b'] = rnd((1, out_ch))
        bp['pw2_w'] = rnd((out_ch, out_ch)); bp['pw2_b'] = rnd((1, out_ch))
        bp['bn2_s'], bp['bn2_sh'] = bn(out_ch)
        if use_se:
            r = out_ch // 16
            bp['se'] = {'w1': rnd((out_ch, r)), 'w2': rnd((r, out_ch))}
        else:
            bp['se'] = None
        if in_ch != out_ch or stride != 1:
            rs, rsh = bn(out_ch)
            bp['res'] = {'w': rnd((in_ch, out_ch)), 'b': rnd((1, out_ch)),
                         'bn_s': rs, 'bn_sh': rsh}
        else:
            bp['res'] = None
        blocks.append(bp)
    p['blocks'] = blocks

    # Global context attention on final `filters` channels
    C = filters
    r = C // 16
    wsq = rnd((1, C))
    bsq = rnd(())
    gamma = 1.0 + rnd(()); beta = rnd(()); rm = rnd(())
    rv = 1.0 + 0.5 * jax.random.uniform(next(keys), (), jnp.float32)
    bn_s = gamma / jnp.sqrt(rv + 1e-5)
    bn_sh = beta - rm * bn_s
    p['gca'] = {
        'wsq': wsq,
        'sqs': jnp.reshape(bn_s, (1, 1)),
        'sqh': jnp.reshape(bsq * bn_s + bn_sh, (1, 1)),
        'w1': rnd((C, r)), 'b1': rnd((1, r)),
        'w2': rnd((r, C)), 'b2': rnd((1, C)),
    }

    p['head_w'] = rnd((C, cfg['num_classes']))
    p['head_b'] = rnd((1, cfg['num_classes']))
    return p


# --------------------------------- forward ----------------------------------

def forward(params, x):
    # x: (B, C_in, L) in PyTorch NCL convention.
    # TODO(synk): this shape-based layout guess exactly mirrors the PyTorch
    # `if x.size(1) > x.size(2)` heuristic; an explicit layout flag would be safer.
    if x.shape[1] > x.shape[2]:
        x = jnp.transpose(x, (0, 2, 1))
    x = jnp.transpose(x, (0, 2, 1)).astype(jnp.float32)      # -> (B, L, C) channels-last
    B, L, Cin = x.shape
    K = params['kernel_size']
    F0 = params['stem_w'].shape[1]

    # --- fused stem conv (k=7,s=2,p=3) + BN + ReLU + maxpool (k=3,s=2,p=1) ---
    L1 = (L + 2 * 3 - 7) // 2 + 1
    assert L1 % 2 == 0
    L2 = L1 // 2
    xp = jnp.pad(x, ((0, 0), (3, 3), (0, 0)))
    cols = jnp.stack([xp[:, k:k + 2 * (L1 - 1) + 1:2, :] for k in range(7)], axis=2)
    xcol = cols.reshape(B, L1, 7 * Cin)                      # (B, L1, K*Cin), tiny (Cin=2)
    xcol_e = xcol[:, 0::2, :]                                # taps for even stem rows
    xcol_o = xcol[:, 1::2, :]                                # taps for odd stem rows
    h = _pcall(_stem_pool_kernel, [xcol_e, xcol_o],
               [params['stem_w'], params['bn1_s'], params['bn1_sh']],
               jax.ShapeDtypeStruct((B, L2, F0), jnp.float32),
               scratch=[pltpu.VMEM((L2, F0), jnp.float32)])

    # --- Xception blocks: one fused pallas_call each ---
    for bp in params['blocks']:
        h = xception_block(h, bp, K)

    # --- fused global context attention + global avg pool + fc ---
    g = params['gca']
    nc = params['head_w'].shape[1]
    out = _pcall(_gca_head_kernel, [h],
                 [g['wsq'], g['sqs'], g['sqh'], g['w1'], g['b1'], g['w2'], g['b2'],
                  params['head_w'], params['head_b']],
                 jax.ShapeDtypeStruct((B, nc), jnp.float32))
    return out


# ----------------------------------- main ------------------------------------

if __name__ == "__main__":
    cfg = dict(input_channels=2, num_classes=5, initial_filters=32,
               depth=6, kernel_size=15)
    params = init_params(jax.random.PRNGKey(1), cfg)

    # small deterministic input: (batch=2, channels=2, length=64), NCL like PyTorch
    x = jax.random.normal(jax.random.PRNGKey(0), (2, cfg['input_channels'], 64),
                          jnp.float32)

    out = forward(params, x)
    out = jax.block_until_ready(out)
    assert out.shape == (2, cfg['num_classes'])
    assert bool(jnp.all(jnp.isfinite(out)))
    print("KERNEL_OK")
</pallas_src>

<mosaic_0001>
module attributes {stable_mosaic.version = 11 : i64} {
  func.func @_stem_pool_kernel(%arg0: i32, %arg1: memref<1x16x14xf32, #tpu.memory_space<vmem>>, %arg2: memref<1x16x14xf32, #tpu.memory_space<vmem>>, %arg3: memref<14x32xf32, #tpu.memory_space<vmem>>, %arg4: memref<1x32xf32, #tpu.memory_space<vmem>>, %arg5: memref<1x32xf32, #tpu.memory_space<vmem>>, %arg6: memref<1x16x32xf32, #tpu.memory_space<vmem>>, %arg7: memref<16x32xf32, #tpu.memory_space<vmem>>) attributes {dimension_semantics = [#tpu.dimension_semantics<parallel>], iteration_bounds = array<i64: 2>, scalar_prefetch = 0 : i64, scratch_operands = 1 : i64, tpu.core_type = #tpu.core_type<tc>, window_params = [{transform_indices = @transform_0, window_bounds = array<i64: 1, 16, 14>}, {transform_indices = @transform_1, window_bounds = array<i64: 1, 16, 14>}, {pipeline_mode = #tpu.pipeline_mode<synchronous>, transform_indices = @transform_2, window_bounds = array<i64: 14, 32>}, {pipeline_mode = #tpu.pipeline_mode<synchronous>, transform_indices = @transform_3, window_bounds = array<i64: 1, 32>}, {pipeline_mode = #tpu.pipeline_mode<synchronous>, transform_indices = @transform_4, window_bounds = array<i64: 1, 32>}, {transform_indices = @transform_5, window_bounds = array<i64: 1, 16, 32>}]} {
    %c0 = arith.constant 0 : index
    %c0_0 = arith.constant 0 : index
    %0 = vector.load %arg3[%c0, %c0_0] : memref<14x32xf32, #tpu.memory_space<vmem>>, vector<14x32xf32>
    %c0_1 = arith.constant 0 : index
    %c0_2 = arith.constant 0 : index
    %c0_3 = arith.constant 0 : index
    %1 = vector.load %arg1[%c0_1, %c0_2, %c0_3] : memref<1x16x14xf32, #tpu.memory_space<vmem>>, vector<1x16x14xf32>
    %2 = vector.shape_cast %1 : vector<1x16x14xf32> to vector<16x14xf32>
    %cst = arith.constant dense<0.000000e+00> : vector<16x32xf32>
    %3 = tpu.matmul %2, %0, %cst {dimension_numbers = #tpu.dot_dimension_numbers<[1], [0], [0], [1], [0, 0, 1, 1], [], []>} : vector<16x14xf32>, vector<14x32xf32>, vector<16x32xf32> -> vector<16x32xf32>
    %c0_4 = arith.constant 0 : index
    %c0_5 = arith.constant 0 : index
    %4 = vector.load %arg4[%c0_4, %c0_5] : memref<1x32xf32, #tpu.memory_space<vmem>>, vector<1x32xf32>
    %5 = vector.broadcast %4 : vector<1x32xf32> to vector<16x32xf32>
    %6 = arith.mulf %3, %5 : vector<16x32xf32>
    %c0_6 = arith.constant 0 : index
    %c0_7 = arith.constant 0 : index
    %7 = vector.load %arg5[%c0_6, %c0_7] : memref<1x32xf32, #tpu.memory_space<vmem>>, vector<1x32xf32>
    %8 = vector.broadcast %7 : vector<1x32xf32> to vector<16x32xf32>
    %9 = arith.addf %6, %8 : vector<16x32xf32>
    %cst_8 = arith.constant 0.000000e+00 : f32
    %10 = vector.broadcast %cst_8 : f32 to vector<16x32xf32>
    %11 = arith.maximumf %9, %10 : vector<16x32xf32>
    %c0_9 = arith.constant 0 : index
    %c0_10 = arith.constant 0 : index
    %c0_11 = arith.constant 0 : index
    %12 = vector.load %arg2[%c0_9, %c0_10, %c0_11] : memref<1x16x14xf32, #tpu.memory_space<vmem>>, vector<1x16x14xf32>
    %13 = vector.shape_cast %12 : vector<1x16x14xf32> to vector<16x14xf32>
    %cst_12 = arith.constant dense<0.000000e+00> : vector<16x32xf32>
    %14 = tpu.matmul %13, %0, %cst_12 {dimension_numbers = #tpu.dot_dimension_numbers<[1], [0], [0], [1], [0, 0, 1, 1], [], []>} : vector<16x14xf32>, vector<14x32xf32>, vector<16x32xf32> -> vector<16x32xf32>
    %c0_13 = arith.constant 0 : index
    %c0_14 = arith.constant 0 : index
    %15 = vector.load %arg4[%c0_13, %c0_14] : memref<1x32xf32, #tpu.memory_space<vmem>>, vector<1x32xf32>
    %16 = vector.broadcast %15 : vector<1x32xf32> to vector<16x32xf32>
    %17 = arith.mulf %14, %16 : vector<16x32xf32>
    %c0_15 = arith.constant 0 : index
    %c0_16 = arith.constant 0 : index
    %18 = vector.load %arg5[%c0_15, %c0_16] : memref<1x32xf32, #tpu.memory_space<vmem>>, vector<1x32xf32>
    %19 = vector.broadcast %18 : vector<1x32xf32> to vector<16x32xf32>
    %20 = arith.addf %17, %19 : vector<16x32xf32>
    %cst_17 = arith.constant 0.000000e+00 : f32
    %21 = vector.broadcast %cst_17 : f32 to vector<16x32xf32>
    %22 = arith.maximumf %20, %21 : vector<16x32xf32>
    %cst_18 = arith.constant 0.000000e+00 : f32
    %23 = vector.broadcast %cst_18 : f32 to vector<16x32xf32>
    %c0_19 = arith.constant 0 : index
    %c0_20 = arith.constant 0 : index
    %24 = vector.load %arg7[%c0_19, %c0_20] : memref<16x32xf32, #tpu.memory_space<vmem>>, vector<16x32xf32>
    tpu.vector_store %arg7[%c0_19, %c0_20], %23 {strides = array<i32>} : memref<16x32xf32, #tpu.memory_space<vmem>>, vector<16x32xf32>,
    %25 = vector.extract_strided_slice %22 {offsets = [0, 0], sizes = [15, 32], strides = [1, 1]} : vector<16x32xf32> to vector<15x32xf32>
    %c1 = arith.constant 1 : index
    %c0_21 = arith.constant 0 : index
    %26 = vector.load %arg7[%c1, %c0_21] : memref<16x32xf32, #tpu.memory_space<vmem>>, vector<15x32xf32>
    tpu.vector_store %arg7[%c1, %c0_21], %25 {strides = array<i32>} : memref<16x32xf32, #tpu.memory_space<vmem>>, vector<15x32xf32>,
    %27 = arith.maximumf %11, %22 : vector<16x32xf32>
    %c0_22 = arith.constant 0 : index
    %c0_23 = arith.constant 0 : index
    %28 = vector.load %arg7[%c0_22, %c0_23] : memref<16x32xf32, #tpu.memory_space<vmem>>, vector<16x32xf32>
    %29 = arith.maximumf %27, %28 : vector<16x32xf32>
    %c0_24 = arith.constant 0 : index
    %c0_25 = arith.constant 0 : index
    %c0_26 = arith.constant 0 : index
    %30 = vector.load %arg6[%c0_24, %c0_25, %c0_26] : memref<1x16x32xf32, #tpu.memory_space<vmem>>, vector<1x16x32xf32>
    %31 = vector.shape_cast %30 : vector<1x16x32xf32> to vector<16x32xf32>
    %32 = vector.shape_cast %29 : vector<16x32xf32> to vector<1x16x32xf32>
    tpu.vector_store %arg6[%c0_24, %c0_25, %c0_26], %32 {strides = array<i32>} : memref<1x16x32xf32, #tpu.memory_space<vmem>>, vector<1x16x32xf32>,
    return
  }
  func.func @transform_0(%arg0: i32) -> (i32, i32, i32) {
    %c0_i32 = arith.constant 0 : i32
    %c0_i32_0 = arith.constant 0 : i32
    %c0_i32_1 = arith.constant 0 : i32
    return %arg0, %c0_i32, %c0_i32_0 : i32, i32, i32
  }
  func.func @transform_1(%arg0: i32) -> (i32, i32, i32) {
    %c0_i32 = arith.constant 0 : i32
    %c0_i32_0 = arith.constant 0 : i32
    %c0_i32_1 = arith.constant 0 : i32
    return %arg0, %c0_i32, %c0_i32_0 : i32, i32, i32
  }
  func.func @transform_2(%arg0: i32) -> (i32, i32) {
    %c0_i32 = arith.constant 0 : i32
    %c0_i32_0 = arith.constant 0 : i32
    %c0_i32_1 = arith.constant 0 : i32
    return %c0_i32, %c0_i32_0 : i32, i32
  }
  func.func @transform_3(%arg0: i32) -> (i32, i32) {
    %c0_i32 = arith.constant 0 : i32
    %c0_i32_0 = arith.constant 0 : i32
    %c0_i32_1 = arith.constant 0 : i32
    return %c0_i32, %c0_i32_0 : i32, i32
  }
  func.func @transform_4(%arg0: i32) -> (i32, i32) {
    %c0_i32 = arith.constant 0 : i32
    %c0_i32_0 = arith.constant 0 : i32
    %c0_i32_1 = arith.constant 0 : i32
    return %c0_i32, %c0_i32_0 : i32, i32
  }
  func.func @transform_5(%arg0: i32) -> (i32, i32, i32) {
    %c0_i32 = arith.constant 0 : i32
    %c0_i32_0 = arith.constant 0 : i32
    %c0_i32_1 = arith.constant 0 : i32
    return %arg0, %c0_i32, %c0_i32_0 : i32, i32, i32
  }
}

</mosaic_0001>

<bundles_post_ra>
// kernel: tpu_custom_call.1
= control target key start
LH: loop header
LB: loop body
LE: loop exit
PB: predicated region body
PF: predicated region fallthrough
CT: control target
= control target key end

     0   :  { %10 = vsyncpa [#allocation4], 0  ;;  %s868_s0 = inlined_call_operand.vmem [shape: f32[2,16,14], index: 0, kind: input, shape index: {}]   ;;  %s869_s1 = inlined_call_operand.vmem [shape: f32[2,16,14], index: 1, kind: input, shape index: {}]   ;;  %s870_s2 = inlined_call_operand.vmem [shape: f32[14,32], index: 2, kind: input, shape index: {}]   ;;  %s871_s3 = inlined_call_operand.vmem [shape: f32[1,32], index: 3, kind: input, shape index: {}]   ;;  %s872_s4 = inlined_call_operand.vmem [shape: f32[1,32], index: 4, kind: input, shape index: {}]   ;;  %s873_s5 = inlined_call_operand.hbm [shape: f32[2,16,32], index: 5, kind: output, shape index: {}]  }
   0x1   :  { %12 = vsyncpa [#allocation4 + $0x1], 0  ;;  %s745_s18 = smov 0   ;;  %s747_s19 = smov 0  }
   0x2   :  { %s749_s20 = smov 0   ;;  %s751_s21 = smov 0  }
   0x3 LB: > { %s766_s22 = sadd.s32 4294967295, %s708_s21   ;;  %s544_s23 = sadd.s32 4294967294, %s708_s21   ;;  %s708_s21 = sphi %s751_s21, %s879_s21   ;;  %s704_s20 = sphi %s749_s20, %s878_s20   ;;  %s700_s19 = sphi %s747_s19, %s877_s19   ;;  %s696_s18 = sphi %s745_s18, %s876_s18  }
   0x4   : > { %s770_s24 = sadd.s32 1, %s708_s21   ;;  %s140_s25 = sadd.s32 1, %s704_s20 }
   0x5   : > { %s137_s26 = ssub.s32 %s708_s21, %s770_s24  ;;  %p150_p0 = scmp.ne.s32.totalorder %s704_s20, %s700_s19 }
   0x6   : > { %p138_p1 = scmp.eq.s32.totalorder %s137_s26, 0  ;;  %p151_p2 = scmp.eq.s32.totalorder %s766_s22, 1 }
   0x7   : > { %p156_p3 = scmp.ne.s32.totalorder %s700_s19, %s696_s18  ;;  %p157_p4 = scmp.eq.s32.totalorder %s544_s23, 1 }
   0x8   : > { %s781_s27 = scalar_select %p138_p1, %s704_s20, %s140_s25  }
   0x9   : > { %p783_p5 = por %p151_p2, %p150_p0  ;;  %p787_p6 = por %p157_p4, %p156_p3 }
   0xa   : > { %p547_p7 = scmp.ge.s32.totalorder %s708_s21, 1  ;;  %p200_p8 = scmp.lt.s32.totalorder %s708_s21, 3 }
   0xc   : > { %p201_p9 = pnand %p547_p7, %p200_p8 }
   0xd   : > { %v243_v0 = vld [vmem:[%s870_s2] sm:$0xff] (!%p201_p9)  ;;  %v244_v1 = vld [vmem:[%s870_s2 + $0x8] sm:$0x3f] (!%p201_p9)  ;;  %vm254_vm0 = vcmask (!%p201_p9), 1045504   ;;  %p233_p10 = scmp.lt.s32.totalorder (!%p201_p9), %s766_s22, 1  ;;  %vm710_vm1 = vmmov (!%p201_p9), 1  }
   0xe   : > { %204 = sbr.rel (%p201_p9) target bundleno = 272 (0x110), region = 40  ;;  %v591_v2 = vpack.c.bf16 (!%p201_p9), %v244_v1, %v243_v0  ;;  %vm592_vm2 = vmpackc.low (!%p201_p9), %vm254_vm0, %vm710_vm1  ;;  %vm247_vm3 = vcmask (!%p201_p9), 113664   ;;  %vm442_vm4 = vcmask (!%p201_p9), 261120   ;;  %v711_v7 = vmov (!%p201_p9), 0.0   ;;  %v556_v8 = vld [vmem:[%s871_s3] ss:$0 sm:$0xff] (!%p201_p9) }
   0xf   : > { %443 = vst.msk [vmem:[#allocation2] sm:$0xff] (!%p201_p9), %vm442_vm4, %v711_v7  ;;  %444 = vst.msk [vmem:[#allocation2 + $0x8] sm:$0xff] (!%p201_p9), %vm442_vm4, %v711_v7  ;;  %v557_v10 = vld [vmem:[%s872_s4] ss:$0 sm:$0xff] (!%p201_p9)  ;;  %s230_s30 = sand.u32 (!%p201_p9), 1, %s700_s19   ;;  %vm446_vm5 = vcmask (!%p201_p9), 260096  }
  0x10   : > { %593 = vmatprep.subr.msk.bf16.mxu0 (!%p201_p9), %vm592_vm2, %v591_v2  ;;  %599 = vmatprep.subr.msk.bf16.mxu1 (!%p201_p9), %vm592_vm2, %v591_v2  ;;  %s548_s6 = sshll.u32 (!%p201_p9), %s230_s30, 4  ;;  %s568_s7 = sshll.u32 (!%p201_p9), %s766_s22, 8 }
  0x11   : > { %596 = vmatpush3.bf16.msk.msra.mxu0 (!%p201_p9), %vm592_vm2, %v591_v2  ;;  %602 = vmatpush3.bf16.msk.msra.mxu1 (!%p201_p9), %vm592_vm2, %v591_v2  ;;  %s232_s8 = scalar_lea.vmem (!%p201_p9), [#allocation3], %s548_s6  ;;  %s821_s12 = scalar_lea.hbm (!%p201_p9), %s873_s5, %s568_s7 }
  0x12   : > { %s712_s14 = smov (!%p201_p9), [#allocation3]  }
  0x13   : > { %s650_s15 = sshll.u32 (!%p201_p9), %s712_s14, 4  ;;  %s651_s15 = int_to_ptr.vmem [resolvable:$false] %s650_s15 }
  0x15   : > { %s234_s9 = scalar_select %p233_p10, %s766_s22, 1 }
  0x16   : > { %s827_s22 = scalar_lea.sflag [#allocation4], %s230_s30 }
  0x17   : > { %s566_s10 = sshll.u32 %s234_s9, 4  ;;  %s470_s9 = sshll.u32 %s232_s8, 4  ;;  %s823_s9 = int_to_ptr.vmem [resolvable:$true] %s470_s9 }
  0x18   : > { %s237_s13 = scalar_lea.vmem %s868_s0, %s566_s10  ;;  %s242_s16 = scalar_lea.vmem %s869_s1, %s566_s10 }
  0x19   : > { %v245_v3 = vld [vmem:[%s237_s13] sm:$0xff]  ;;  %v246_v4 = vld [vmem:[%s237_s13 + $0x8] sm:$0xff]  ;;  %s646_s13 = scalar_lea.vmem %s823_s9, 256  ;;  %p653_p0 = scmp.lt.s32.totalorder %s823_s9, %s651_s15 }
  0x1a   : > { %v353_v5 = vld [vmem:[%s242_s16] sm:$0xff]  ;;  %581 = vmatprep.mubr.msk.f32.mxu0 %vm247_vm3, %v245_v3  ;;  %v354_v6 = vld [vmem:[%s242_s16 + $0x8] sm:$0xff]  ;;  %p647_p11 = scmp.ne.s32.totalorder %s823_s9, %s646_s13  ;;  %s652_s16 = scalar_lea.vmem %s651_s15, 512 }
  0x1b   : > { %588 = vmatprep.mubr.msk.f32.mxu1 %vm247_vm3, %v353_v5  ;;  %582 = vmatmul.mubr.msk.f32.vlgmr.msra.gmra.mrb[0].mxu0 %vm247_vm3, %v246_v4  ;;  %p654_p1 = scmp.lt.s32.totalorder %s652_s16, %s646_s13 }
  0x1c   : > { %589 = vmatmul.mubr.msk.f32.vlgmr.msra.gmra.mrb[0].mxu1 %vm247_vm3, %v354_v6  ;;  %p648_p12 = pnand %p647_p11, %p783_p5 }
  0x1d   : > { %p655_p2 = por %p654_p1, %p653_p0 }
  0x1e   : > { %p649_p13 = pneg %p648_p12 }
  0x20   : > { %p656_p3 = pnand %p655_p2, %p649_p13 }
  0xee   : > { %v583_v9 = vpop.f32.mrb[0].mxu0 }
  0xef   : > { %v590_v11 = vpop.f32.mrb[0].mxu1  ;;  %v341_v12 = vmul.f32 %v583_v9, %v556_v8  ;;  %v324_v14 = vpop.f32.mrb[1].mxu0 }
  0xf0   : > { %v437_v13 = vmul.f32 %v590_v11, %v556_v8  ;;  %v427_v15 = vpop.f32.mrb[1].mxu1  ;;  %v340_v16 = vmul.f32 %v556_v8, %v324_v14 }
  0xf1   : > { %v436_v17 = vmul.f32 %v556_v8, %v427_v15  ;;  %v350_v18 = vadd.f32 %v557_v10, %v341_v12 }
  0xf2   : > { %v439_v19 = vadd.f32 %v557_v10, %v437_v13  ;;  %v349_v20 = vadd.f32 %v557_v10, %v340_v16 }
  0xf3   : > { %v438_v21 = vadd.f32 %v557_v10, %v436_v17  ;;  %v352_v22 = vmax.f32 %v350_v18, 0.0 }
  0xf4   : > { %v441_v23 = vmax.f32 %v439_v19, 0.0  ;;  %v351_v24 = vmax.f32 %v349_v20, 0.0 }
  0xf5   : > { %v440_v25 = vmax.f32 %v438_v21, 0.0 }
  0xf6   : > { %447 = vst.msk [vmem:[#allocation2 + $0x9] sm:$0x7f] %vm446_vm5, %v441_v23  ;;  %v449_v26 = vmax.f32 %v352_v22, %v441_v23 }
  0xf7   : > { %445 = vst.msk [vmem:[#allocation2 + $0x1] sm:$0xff] %vm442_vm4, %v440_v25  ;;  %v448_v27 = vmax.f32 %v351_v24, %v440_v25 }
  0xfe   : > { %v450_v28 = vld [vmem:[#allocation2] sm:$0xff]  ;;  %v451_v29 = vld [vmem:[#allocation2 + $0x8] sm:$0xff] }
  0xff   : > { %v452_v30 = vmax.f32 %v448_v27, %v450_v28  ;;  %v453_v31 = vmax.f32 %v449_v26, %v451_v29 }
 0x101   : > { %454 = vst.msk [vmem:[%s232_s8] sm:$0xff] %vm442_vm4, %v452_v30  ;;  %455 = vst.msk [vmem:[%s232_s8 + $0x8] sm:$0xff] %vm442_vm4, %v453_v31 }
 0x102   : > { %659 = shalt.err (!%p656_p3)
}
 0x103   : > { %s660_s17 = scalar_lea.hbm %s821_s12, 256  ;;  %s664_s26 = scalar_lea.hbm %s873_s5, 512 }
 0x104   : > { %p661_p4 = scmp.ne.s32.totalorder %s821_s12, %s660_s17  ;;  %p665_p9 = scmp.lt.u32.totalorder %s821_s12, %s873_s5 }
 0x105   : > { %p666_p10 = scmp.lt.u32.totalorder %s664_s26, %s660_s17  ;;  %p668_p12 = scmp.lt.u32.totalorder %s660_s17, %s821_s12 }
 0x106   : > { %p662_p7 = pnand %p661_p4, %p783_p5 }
 0x107   : > { %p667_p11 = por %p666_p10, %p665_p9 }
 0x108   : > { %p663_p8 = pneg %p662_p7 }
 0x109   : > { %p669_p13 = por %p668_p12, %p667_p11 }
 0x10b   : > { %p670_p0 = pnand %p669_p13, %p663_p8 }
 0x10d   : > { %673 = shalt.err (!%p670_p0)
}
 0x10e   : > { %s713_s7 = smov 128   ;;  %s714_s8 = smov 8  }
 0x10f   : > { %603 = dma.vmem_to_hbm [thread:$0]  (%p783_p5), %s823_s9, 256, %s821_s12, %s827_s22, %s713_s7, %s713_s7, %s714_s8  }
 0x110 PF: > { %p609_p1 = scmp.ge.s32.totalorder %s708_s21, 2  ;;  %s485_s10 = sand.u32 1, %s696_s18  }
 0x111   : > { %s486_s11 = scalar_lea.sflag [#allocation4], %s485_s10 }
 0x112   : > { %p606_p2 = pnand %p609_p1, %p787_p6 }
 0x114   : > { %691 = dma.done.wait (!%p606_p2), %s486_s11, 256  }
 0x115   : > { %693 = vsyncadd (!%p606_p2), %s486_s11, 4294967040  ;;  %p15_p3 = scmp.ge.s32.totalorder %s770_s24, 4   ;;  %s876_s18 = smov %s700_s19 }
 0x116   : > { %s877_s19 = smov %s704_s20  ;;  %s878_s20 = smov %s781_s27 }
 0x117   : > { %s879_s21 = smov %s770_s24  ;;  %17 = sbr.rel (!%p15_p3) target bundleno = 3 (0x3), region = 78 }
 0x11e   :  { %491 = vsyncpa [#allocation4], 1 }
 0x11f   :  { %493 = vsyncpa [#allocation4 + $0x1], 1 }

</bundles_post_ra>
